<compile_context>
chip_gen: v6e
topology: v6e:2x2x1
jax: 0.10.0
libtpu: 0.0.40
codegen_flags: <defaults>
</compile_context>

<pallas_src>
import jax
import jax.numpy as jnp
from jax.experimental import pallas as pl
from jax.experimental.pallas import tpu as pltpu


# ----------------------------------------------------------------------------
# helpers
# ----------------------------------------------------------------------------
def _round_up(x, m):
    return ((x + m - 1) // m) * m


def _mxu_align():
    """256 for v6e/v7x-style 256-wide MXUs, 128 for v5e and older."""
    try:
        kind = jax.devices()[0].device_kind.lower()
    except Exception:
        return 256
    for old in ("v2", "v3", "v4", "v5"):
        if old in kind:
            return 128
    return 256


def _vmem_limit_bytes():
    """~75% of physical VMEM: ≈96 MiB on v5e/v6e (128 MiB), ≈48 MiB on v7x (64 MiB)."""
    try:
        cap = int(pltpu.get_tpu_info().vmem_capacity_bytes)
    except Exception:
        cap = 64 * 1024 * 1024
    return int(min(cap * 3 // 4, 100 * 1024 * 1024))


def _pad_dim(d, align):
    """Lane-dense (>=128); 256-aligned on 256-wide MXUs once the dim exceeds 128."""
    p = _round_up(d, 128)
    if align == 256 and d > 128:
        p = _round_up(d, 256)
    return p


def _choose_tm(n, align):
    """Row tile: as large as possible without excessive row padding."""
    n8 = _round_up(n, 8)
    if n8 <= 512:
        return n8                      # single row tile, minimal padding
    cands = [512, 384, 256] + ([128] if align == 128 else [])
    # minimize padded rows; break ties toward the larger tile
    return min(cands, key=lambda t: (_round_up(n, t) - n, -t))


# ----------------------------------------------------------------------------
# kernels
# ----------------------------------------------------------------------------
def _moe_dropout_resident_kernel(skip_ref, x_ref, w1_ref, b1_ref, w2_ref, b2_ref,
                                 o_ref):
    # Grid: (row tiles,).  W1/W2/b1/b2 are VMEM-resident (constant index_map).
    # skip_ref: (TM, 1) int32   1 => pass-through, 0 => apply expert
    # x_ref:    (TM, Dp)  native dtype (MXU operand)
    # w1_ref:   (Dp, Hp), b1_ref: (1, Hp), w2_ref: (Hp, Dp), b2_ref: (1, Dp)
    x = x_ref[...]
    h = jnp.dot(x, w1_ref[...], preferred_element_type=jnp.float32)
    h = jnp.maximum(h + b1_ref[...].astype(jnp.float32), 0.0)
    y = jnp.dot(h.astype(w2_ref.dtype), w2_ref[...],
                preferred_element_type=jnp.float32)
    y = y + b2_ref[...].astype(jnp.float32)
    keep = skip_ref[...] == 0                      # (TM, 1) bool -> broadcast
    # Skipped rows pass through in their original dtype (exact pass-through).
    o_ref[...] = jnp.where(keep, y.astype(o_ref.dtype), x)


def _moe_dropout_tiled_kernel(skip_ref, x_ref, w1_ref, b1_ref, w2_ref, b2_ref,
                              o_ref, acc_ref):
    # Grid: (row tiles, hidden-dim reduction tiles).  Fallback when weights do
    # not fit VMEM-resident.
    k = pl.program_id(1)
    x = x_ref[...]
    h = jnp.dot(x, w1_ref[...], preferred_element_type=jnp.float32)
    h = jnp.maximum(h + b1_ref[...].astype(jnp.float32), 0.0)
    part = jnp.dot(h.astype(w2_ref.dtype), w2_ref[...],
                   preferred_element_type=jnp.float32)

    @pl.when(k == 0)
    def _():
        acc_ref[...] = part            # init by overwrite (no zero + add)

    @pl.when(k != 0)
    def _():
        acc_ref[...] += part

    @pl.when(k == pl.num_programs(1) - 1)
    def _():
        y = acc_ref[...] + b2_ref[...].astype(jnp.float32)
        keep = skip_ref[...] == 0
        o_ref[...] = jnp.where(keep, y.astype(o_ref.dtype), x)


# ----------------------------------------------------------------------------
# wrapper
# ----------------------------------------------------------------------------
def moe_layer_dropout_call(x, skip, w1, b1, w2, b2):
    """Fused expert MLP + per-row layer-dropout select.

    x: (N, D), skip: (N,) with nonzero => pass-through, 0 => apply expert.
    w1: (D, H), b1: (H,) or (1, H), w2: (H, D), b2: (D,) or (1, D).
    """
    n, d = x.shape
    hdim = w1.shape[1]

    align = _mxu_align()
    limit = _vmem_limit_bytes()

    dp = _pad_dim(d, align)
    hp = _pad_dim(hdim, align)

    xb = jnp.dtype(x.dtype).itemsize
    wb = jnp.dtype(w1.dtype).itemsize

    tm0 = _choose_tm(n, align)
    tm_floor = min(tm0, 128 if align == 128 else 256)

    def resident_est(tm_):
        return (2 * tm_ * dp * xb          # x tile (double-buffered)
                + 2 * tm_ * dp * xb        # out tile
                + 2 * tm_ * 4              # skip column (int32)
                + 2 * dp * hp * wb         # W1 (conservatively counted 2x)
                + 2 * hp * dp * wb         # W2
                + 2 * (hp + dp) * wb       # biases
                + tm_ * hp * (4 + wb)      # f32 hidden + cast copy
                + tm_ * dp * 4)            # f32 result

    def tiled_est(tm_, th_):
        return (2 * tm_ * dp * xb
                + 2 * tm_ * dp * xb
                + 2 * tm_ * 4
                + 2 * dp * th_ * wb
                + 2 * th_ * dp * wb
                + 2 * (th_ + dp) * wb
                + tm_ * dp * 4             # f32 accumulator scratch
                + tm_ * th_ * (4 + wb))    # f32 hidden + cast copy

    # ---- Path A: weight-resident (preferred; weights DMA'd from HBM once) ----
    tm = tm0
    while tm > tm_floor and resident_est(tm) > limit:
        tm = max(tm_floor, _round_up(tm // 2, 8))
    use_resident = resident_est(tm) <= limit

    th = None
    if not use_resident:
        # ---- Path B: tile the hidden (reduction) dim on the grid ----
        tm = tm0
        th = min(512, hp)
        # Shrink th first (keeps the MXU M dimension large), then tm down to
        # the floor, then tm further only as a last resort.
        while tiled_est(tm, th) > limit and th > 128:
            th = max(128, _round_up(th // 2, 128))
        while tiled_est(tm, th) > limit and tm > tm_floor:
            tm = max(tm_floor, _round_up(tm // 2, 8))
        while tiled_est(tm, th) > limit and tm > 8:
            tm = max(8, _round_up(tm // 2, 8))
        if tiled_est(tm, th) > limit:
            raise ValueError(
                "MoELayerDropout kernel does not fit in VMEM: minimum tile "
                f"config (tm={tm}, th={th}) needs {tiled_est(tm, th)} bytes, "
                f"limit is {limit} bytes.")
        hp = _round_up(hp, th)             # th need not divide H; pad H up

    np_ = _round_up(n, tm)

    # Zero-padding is exact: padded hidden columns contribute relu(0)=0 through
    # zero W2 rows; padded feature columns multiply zero W1 rows; padded rows
    # are marked skip=1 and pass through (then sliced off).
    x_p = jnp.pad(x, ((0, np_ - n), (0, dp - d)))
    skip_i = (jnp.asarray(skip).reshape(n, 1) != 0).astype(jnp.int32)
    skip_p = jnp.pad(skip_i, ((0, np_ - n), (0, 0)), constant_values=1)
    w1_p = jnp.pad(w1, ((0, dp - d), (0, hp - hdim)))
    b1_p = jnp.pad(b1.reshape(1, -1), ((0, 0), (0, hp - hdim)))
    w2_p = jnp.pad(w2, ((0, hp - hdim), (0, dp - d)))
    b2_p = jnp.pad(b2.reshape(1, -1), ((0, 0), (0, dp - d)))

    n_row_tiles = np_ // tm
    weight_bytes = (w1_p.size + w2_p.size + b1_p.size + b2_p.size) * wb
    weight_streams = 1 if use_resident else n_row_tiles
    cost = pl.CostEstimate(
        flops=int(4 * np_ * dp * hp),
        transcendentals=0,
        bytes_accessed=int(2 * np_ * dp * xb + np_ * 4
                           + weight_bytes * weight_streams))

    if use_resident:
        out_p = pl.pallas_call(
            _moe_dropout_resident_kernel,
            out_shape=jax.ShapeDtypeStruct((np_, dp), x.dtype),
            grid_spec=pltpu.PrefetchScalarGridSpec(
                num_scalar_prefetch=0,
                grid=(n_row_tiles,),
                in_specs=[
                    pl.BlockSpec((tm, 1), lambda i: (i, 0)),     # skip column
                    pl.BlockSpec((tm, dp), lambda i: (i, 0)),    # x row tile
                    pl.BlockSpec((dp, hp), lambda i: (0, 0)),    # W1 (resident)
                    pl.BlockSpec((1, hp), lambda i: (0, 0)),     # b1 (resident)
                    pl.BlockSpec((hp, dp), lambda i: (0, 0)),    # W2 (resident)
                    pl.BlockSpec((1, dp), lambda i: (0, 0)),     # b2 (resident)
                ],
                out_specs=pl.BlockSpec((tm, dp), lambda i: (i, 0)),
            ),
            compiler_params=pltpu.CompilerParams(
                dimension_semantics=("parallel",),
                vmem_limit_bytes=limit),
            cost_estimate=cost,
        )(skip_p, x_p, w1_p, b1_p, w2_p, b2_p)
    else:
        out_p = pl.pallas_call(
            _moe_dropout_tiled_kernel,
            out_shape=jax.ShapeDtypeStruct((np_, dp), x.dtype),
            grid_spec=pltpu.PrefetchScalarGridSpec(
                num_scalar_prefetch=0,
                grid=(n_row_tiles, hp // th),
                in_specs=[
                    pl.BlockSpec((tm, 1), lambda i, k: (i, 0)),   # skip column
                    pl.BlockSpec((tm, dp), lambda i, k: (i, 0)),  # x row tile
                    pl.BlockSpec((dp, th), lambda i, k: (0, k)),  # W1 hidden tile
                    pl.BlockSpec((1, th), lambda i, k: (0, k)),   # b1 hidden tile
                    pl.BlockSpec((th, dp), lambda i, k: (k, 0)),  # W2 hidden tile
                    pl.BlockSpec((1, dp), lambda i, k: (0, 0)),   # b2 (resident)
                ],
                out_specs=pl.BlockSpec((tm, dp), lambda i, k: (i, 0)),
                scratch_shapes=[pltpu.VMEM((tm, dp), jnp.float32)],
            ),
            compiler_params=pltpu.CompilerParams(
                dimension_semantics=("parallel", "arbitrary"),
                vmem_limit_bytes=limit),
            cost_estimate=cost,
        )(skip_p, x_p, w1_p, b1_p, w2_p, b2_p)

    return out_p[:n, :d]


class MoELayerDropout:
    """JAX/Pallas port of the PyTorch MoELayerDropout (dim=0 only)."""

    def __init__(self, prob=0.0, dim=0, disable_on_eval=True, seed=None):
        assert dim == 0, "kernel layout fixes the dropout dim to 0"
        self.prob = prob
        self.dim = dim
        self.disable_on_eval = disable_on_eval
        self.training = True
        self._key = jax.random.PRNGKey(0 if seed is None else seed)
        self.inferred = None
        # TODO(synk): tuple-returning experts (out, aux_loss) are not supported;
        # the aux-loss merge branch of the PyTorch module is omitted.
        # TODO(synk): dropped rows still execute the expert (masked by the final
        # where); a scalar-prefetch gather of kept rows would skip that work.

    def __call__(self, expert_params, x):
        n = x.shape[self.dim]
        if self.prob == 0 or (self.disable_on_eval and not self.training):
            self.inferred = 1.0
            skip = jnp.zeros((n,), dtype=x.dtype)      # apply expert everywhere
        else:
            self._key, sub = jax.random.split(self._key)
            skip = jax.random.bernoulli(sub, self.prob, (n,)).astype(x.dtype)
            # lazy device value -- no host sync on every call
            self.inferred = 1.0 - jnp.mean(skip)
        w1, b1, w2, b2 = expert_params
        return moe_layer_dropout_call(x, skip, w1, b1, w2, b2), skip


def _reference(x, skip, w1, b1, w2, b2):
    xf = x.astype(jnp.float32)
    y = jnp.maximum(xf @ w1 + b1.reshape(1, -1), 0.0) @ w2 + b2.reshape(1, -1)
    keep = (skip == 0).reshape(-1, 1)
    return jnp.where(keep, y.astype(x.dtype), x)


if __name__ == "__main__":
    N, D, H = 16, 32, 64

    key = jax.random.PRNGKey(0)
    kx, kw1, kb1, kw2, kb2 = jax.random.split(key, 5)
    x = jax.random.normal(kx, (N, D), dtype=jnp.float32)
    w1 = jax.random.normal(kw1, (D, H), dtype=jnp.float32) * 0.1
    b1 = jax.random.normal(kb1, (1, H), dtype=jnp.float32) * 0.1
    w2 = jax.random.normal(kw2, (H, D), dtype=jnp.float32) * 0.1
    b2 = jax.random.normal(kb2, (1, D), dtype=jnp.float32) * 0.1
    params = (w1, b1, w2, b2)

    # Training mode with prob > 0: some rows skip the expert, others run it.
    layer = MoELayerDropout(prob=0.5, dim=0, disable_on_eval=True, seed=42)
    out_train, skip_train = layer(params, x)
    out_train = jax.block_until_ready(out_train)
    ref_train = _reference(x, skip_train, w1, b1, w2, b2)
    assert jnp.allclose(out_train, ref_train, rtol=1e-5, atol=1e-4), \
        "train-mode mismatch"

    # Eval mode (disable_on_eval): expert applied to every row, inferred == 1.0.
    layer.training = False
    out_eval, skip_eval = layer(params, x)
    out_eval = jax.block_until_ready(out_eval)
    ref_eval = _reference(x, skip_eval, w1, b1, w2, b2)
    assert jnp.allclose(out_eval, ref_eval, rtol=1e-5, atol=1e-4), \
        "eval-mode mismatch"
    assert layer.inferred == 1.0

    print("KERNEL_OK")
</pallas_src>

<mosaic_0001>
module attributes {stable_mosaic.version = 11 : i64} {
  func.func @_moe_dropout_resident_kernel(%arg0: i32, %arg1: memref<16x1xi32, #tpu.memory_space<vmem>>, %arg2: memref<16x128xf32, #tpu.memory_space<vmem>>, %arg3: memref<128x128xf32, #tpu.memory_space<vmem>>, %arg4: memref<1x128xf32, #tpu.memory_space<vmem>>, %arg5: memref<128x128xf32, #tpu.memory_space<vmem>>, %arg6: memref<1x128xf32, #tpu.memory_space<vmem>>, %arg7: memref<16x128xf32, #tpu.memory_space<vmem>>) attributes {dimension_semantics = [#tpu.dimension_semantics<parallel>], iteration_bounds = array<i64: 1>, scalar_prefetch = 0 : i64, scratch_operands = 0 : i64, tpu.core_type = #tpu.core_type<tc>, window_params = [{transform_indices = @transform_0, window_bounds = array<i64: 16, 1>}, {transform_indices = @transform_1, window_bounds = array<i64: 16, 128>}, {pipeline_mode = #tpu.pipeline_mode<synchronous>, transform_indices = @transform_2, window_bounds = array<i64: 128, 128>}, {pipeline_mode = #tpu.pipeline_mode<synchronous>, transform_indices = @transform_3, window_bounds = array<i64: 1, 128>}, {pipeline_mode = #tpu.pipeline_mode<synchronous>, transform_indices = @transform_4, window_bounds = array<i64: 128, 128>}, {pipeline_mode = #tpu.pipeline_mode<synchronous>, transform_indices = @transform_5, window_bounds = array<i64: 1, 128>}, {transform_indices = @transform_6, window_bounds = array<i64: 16, 128>}]} {
    %c0 = arith.constant 0 : index
    %c0_0 = arith.constant 0 : index
    %0 = vector.load %arg2[%c0, %c0_0] : memref<16x128xf32, #tpu.memory_space<vmem>>, vector<16x128xf32>
    %c0_1 = arith.constant 0 : index
    %c0_2 = arith.constant 0 : index
    %1 = vector.load %arg3[%c0_1, %c0_2] : memref<128x128xf32, #tpu.memory_space<vmem>>, vector<128x128xf32>
    %cst = arith.constant dense<0.000000e+00> : vector<16x128xf32>
    %2 = tpu.matmul %0, %1, %cst {dimension_numbers = #tpu.dot_dimension_numbers<[1], [0], [0], [1], [0, 0, 1, 1], [], []>} : vector<16x128xf32>, vector<128x128xf32>, vector<16x128xf32> -> vector<16x128xf32>
    %c0_3 = arith.constant 0 : index
    %c0_4 = arith.constant 0 : index
    %3 = vector.load %arg4[%c0_3, %c0_4] : memref<1x128xf32, #tpu.memory_space<vmem>>, vector<1x128xf32>
    %4 = vector.broadcast %3 : vector<1x128xf32> to vector<16x128xf32>
    %5 = arith.addf %2, %4 : vector<16x128xf32>
    %cst_5 = arith.constant 0.000000e+00 : f32
    %6 = vector.broadcast %cst_5 : f32 to vector<16x128xf32>
    %7 = arith.maximumf %5, %6 : vector<16x128xf32>
    %c0_6 = arith.constant 0 : index
    %c0_7 = arith.constant 0 : index
    %8 = vector.load %arg5[%c0_6, %c0_7] : memref<128x128xf32, #tpu.memory_space<vmem>>, vector<128x128xf32>
    %cst_8 = arith.constant dense<0.000000e+00> : vector<16x128xf32>
    %9 = tpu.matmul %7, %8, %cst_8 {dimension_numbers = #tpu.dot_dimension_numbers<[1], [0], [0], [1], [0, 0, 1, 1], [], []>} : vector<16x128xf32>, vector<128x128xf32>, vector<16x128xf32> -> vector<16x128xf32>
    %c0_9 = arith.constant 0 : index
    %c0_10 = arith.constant 0 : index
    %10 = vector.load %arg6[%c0_9, %c0_10] : memref<1x128xf32, #tpu.memory_space<vmem>>, vector<1x128xf32>
    %11 = vector.broadcast %10 : vector<1x128xf32> to vector<16x128xf32>
    %12 = arith.addf %9, %11 : vector<16x128xf32>
    %c0_11 = arith.constant 0 : index
    %c0_12 = arith.constant 0 : index
    %13 = vector.load %arg1[%c0_11, %c0_12] : memref<16x1xi32, #tpu.memory_space<vmem>>, vector<16x1xi32>
    %c0_i32 = arith.constant 0 : i32
    %14 = vector.broadcast %c0_i32 : i32 to vector<16x1xi32>
    %15 = arith.cmpi eq, %13, %14 : vector<16x1xi32>
    %16 = vector.shape_cast %15 : vector<16x1xi1> to vector<16x1xi1>
    %17 = vector.broadcast %16 : vector<16x1xi1> to vector<16x128xi1>
    %18 = arith.select %17, %12, %0 : vector<16x128xi1>, vector<16x128xf32>
    %c0_13 = arith.constant 0 : index
    %c0_14 = arith.constant 0 : index
    %19 = vector.load %arg7[%c0_13, %c0_14] : memref<16x128xf32, #tpu.memory_space<vmem>>, vector<16x128xf32>
    tpu.vector_store %arg7[%c0_13, %c0_14], %18 {strides = array<i32>} : memref<16x128xf32, #tpu.memory_space<vmem>>, vector<16x128xf32>,
    return
  }
  func.func @transform_0(%arg0: i32) -> (i32, i32) {
    %c0_i32 = arith.constant 0 : i32
    %c0_i32_0 = arith.constant 0 : i32
    return %arg0, %c0_i32 : i32, i32
  }
  func.func @transform_1(%arg0: i32) -> (i32, i32) {
    %c0_i32 = arith.constant 0 : i32
    %c0_i32_0 = arith.constant 0 : i32
    return %arg0, %c0_i32 : i32, i32
  }
  func.func @transform_2(%arg0: i32) -> (i32, i32) {
    %c0_i32 = arith.constant 0 : i32
    %c0_i32_0 = arith.constant 0 : i32
    %c0_i32_1 = arith.constant 0 : i32
    return %c0_i32, %c0_i32_0 : i32, i32
  }
  func.func @transform_3(%arg0: i32) -> (i32, i32) {
    %c0_i32 = arith.constant 0 : i32
    %c0_i32_0 = arith.constant 0 : i32
    %c0_i32_1 = arith.constant 0 : i32
    return %c0_i32, %c0_i32_0 : i32, i32
  }
  func.func @transform_4(%arg0: i32) -> (i32, i32) {
    %c0_i32 = arith.constant 0 : i32
    %c0_i32_0 = arith.constant 0 : i32
    %c0_i32_1 = arith.constant 0 : i32
    return %c0_i32, %c0_i32_0 : i32, i32
  }
  func.func @transform_5(%arg0: i32) -> (i32, i32) {
    %c0_i32 = arith.constant 0 : i32
    %c0_i32_0 = arith.constant 0 : i32
    %c0_i32_1 = arith.constant 0 : i32
    return %c0_i32, %c0_i32_0 : i32, i32
  }
  func.func @transform_6(%arg0: i32) -> (i32, i32) {
    %c0_i32 = arith.constant 0 : i32
    %c0_i32_0 = arith.constant 0 : i32
    return %arg0, %c0_i32 : i32, i32
  }
}

</mosaic_0001>

<bundles_post_ra>
// kernel: tpu_custom_call.1
= control target key start
LH: loop header
LB: loop body
LE: loop exit
PB: predicated region body
PF: predicated region fallthrough
CT: control target
= control target key end

     0   :  { %11 = vsyncpa [#allocation3], 0  ;;  %s550_s0 = inlined_call_operand.vmem [shape: s32[16,1], index: 0, kind: input, shape index: {}]   ;;  %s551_s1 = inlined_call_operand.vmem [shape: f32[16,128], index: 1, kind: input, shape index: {}]   ;;  %s552_s2 = inlined_call_operand.hbm [shape: f32[128,128], index: 2, kind: input, shape index: {}]   ;;  %s553_s3 = inlined_call_operand.vmem [shape: f32[1,128], index: 3, kind: input, shape index: {}]   ;;  %s554_s4 = inlined_call_operand.hbm [shape: f32[128,128], index: 4, kind: input, shape index: {}]   ;;  %s555_s5 = inlined_call_operand.vmem [shape: f32[1,128], index: 5, kind: input, shape index: {}]   ;;  %s556_s6 = inlined_call_operand.hbm [shape: f32[16,128], index: 6, kind: output, shape index: {}]  }
   0x1   :  { %12 = vsyncpa [#allocation6], 0 }
   0x2   :  { %13 = vsyncpa [#allocation4], 0  ;;  %s469_s21 = smov [#allocation2]  }
   0x3   :  { %s23_s22 = sshll.u32 %s469_s21, 4  ;;  %s24_s22 = int_to_ptr.vmem [resolvable:$true] %s23_s22 }
   0x4   :  { %s411_s23 = scalar_lea.vmem %s24_s22, 2048  ;;  %p416_p1 = scmp.lt.s32.totalorder %s24_s22, %s24_s22 }
   0x5   :  { %p412_p0 = scmp.ne.s32.totalorder %s24_s22, %s411_s23  ;;  %p417_p2 = scmp.lt.s32.totalorder %s411_s23, %s411_s23 }
   0x7   :  { %p418_p3 = por %p417_p2, %p416_p1 }
   0x9   :  { %p419_p4 = pnand %p418_p3, %p412_p0 }
   0xb   :  { %422 = shalt.err (!%p419_p4)
}
   0xc   :  { %s470_s24 = smov 128   ;;  %s471_s25 = smov 8  }
   0xd   :  { %29 = dma.hbm_to_vmem [thread:$0]  %s552_s2, 2048, %s24_s22, [#allocation3], %s470_s24, %s470_s24, %s471_s25  }
   0xe   :  { %s472_s28 = smov [#allocation5]  }
   0xf   :  { %s37_s29 = sshll.u32 %s472_s28, 4  ;;  %s38_s29 = int_to_ptr.vmem [resolvable:$true] %s37_s29 }
  0x10   :  { %s431_s30 = scalar_lea.vmem %s38_s29, 2048  ;;  %p436_p6 = scmp.lt.s32.totalorder %s38_s29, %s38_s29 }
  0x11   :  { %p432_p5 = scmp.ne.s32.totalorder %s38_s29, %s431_s30  ;;  %p437_p7 = scmp.lt.s32.totalorder %s431_s30, %s431_s30 }
  0x13   :  { %p438_p8 = por %p437_p7, %p436_p6 }
  0x15   :  { %p439_p9 = pnand %p438_p8, %p432_p5 }
  0x17   :  { %442 = shalt.err (!%p439_p9)
}
  0x18   :  { %43 = dma.hbm_to_vmem [thread:$0]  %s554_s4, 2048, %s38_s29, [#allocation6], %s470_s24, %s470_s24, %s471_s25  }
  0x19   :  { %463 = dma.done.wait [#allocation3], 2048  }
  0x1a   :  { %464 = vsyncadd [#allocation3], 4294965248 }
  0x1b   :  { %465 = dma.done.wait [#allocation6], 2048  }
  0x1c   :  { %466 = vsyncadd [#allocation6], 4294965248  ;;  %v69_v0 = vld [vmem:[#allocation2 + $0x78] sm:$0xff]  ;;  %v68_v1 = vld [vmem:[#allocation2 + $0x70] sm:$0xff]  ;;  %v473_v36 = vmov 0   ;;  %s474_s17 = smov [#allocation7]  }
  0x1d   :  { %326 = vmatprep.subr.mxu0 %v69_v0  ;;  %v67_v2 = vld [vmem:[#allocation2 + $0x68] sm:$0xff]  ;;  %v66_v3 = vld [vmem:[#allocation2 + $0x60] sm:$0xff]  ;;  %v65_v5 = vld [vmem:[#allocation2 + $0x58] sm:$0xff]  ;;  %402 = vset.pattern.permute.xlu0 %v473_v36  ;;  %s275_s18 = sshll.u32 %s474_s17, 4  ;;  %s276_s18 = int_to_ptr.vmem [resolvable:$true] %s275_s18 }
  0x1e   :  { %327 = vmatpush3.msra.mxu0 %v69_v0  ;;  %v525_v4 = vld [vmem:[%s551_s1] sm:$0xff]  ;;  %v169_v6 = vld [vmem:[#allocation5 + $0x78] sm:$0xff]  ;;  %v168_v7 = vld [vmem:[#allocation5 + $0x70] sm:$0xff]  ;;  %p448_p11 = scmp.lt.s32.totalorder %s276_s18, %s276_s18 }
  0x1f   :  { %328 = vmatprep.subr.mxu0 %v68_v1  ;;  %358 = vmatprep.mubr.f32.mxu0 %v525_v4  ;;  %v64_v8 = vld [vmem:[#allocation2 + $0x50] sm:$0xff]  ;;  %v167_v9 = vld [vmem:[#allocation5 + $0x68] sm:$0xff]  ;;  %v166_v11 = vld [vmem:[#allocation5 + $0x60] sm:$0xff] }
  0x20   :  { %329 = vmatpush3.msra.mxu0 %v68_v1  ;;  %361 = vmatprep.subr.mxu1 %v169_v6  ;;  %v63_v10 = vld [vmem:[#allocation2 + $0x48] sm:$0xff]  ;;  %v62_v12 = vld [vmem:[#allocation2 + $0x40] sm:$0xff]  ;;  %v165_v13 = vld [vmem:[#allocation5 + $0x58] sm:$0xff] }
  0x21   :  { %330 = vmatprep.subr.mxu0 %v67_v2  ;;  %362 = vmatpush3.msra.mxu1 %v169_v6  ;;  %v61_v14 = vld [vmem:[#allocation2 + $0x38] sm:$0xff]  ;;  %v164_v15 = vld [vmem:[#allocation5 + $0x50] sm:$0xff]  ;;  %v163_v17 = vld [vmem:[#allocation5 + $0x48] sm:$0xff] }
  0x22   :  { %331 = vmatpush3.msra.mxu0 %v67_v2  ;;  %363 = vmatprep.subr.mxu1 %v168_v7  ;;  %v60_v16 = vld [vmem:[#allocation2 + $0x30] sm:$0xff]  ;;  %v59_v18 = vld [vmem:[#allocation2 + $0x28] sm:$0xff]  ;;  %v162_v19 = vld [vmem:[#allocation5 + $0x40] sm:$0xff] }
  0x23   :  { %332 = vmatprep.subr.mxu0 %v66_v3  ;;  %364 = vmatpush3.msra.mxu1 %v168_v7  ;;  %v58_v20 = vld [vmem:[#allocation2 + $0x20] sm:$0xff]  ;;  %v161_v21 = vld [vmem:[#allocation5 + $0x38] sm:$0xff]  ;;  %v160_v23 = vld [vmem:[#allocation5 + $0x30] sm:$0xff] }
  0x24   :  { %333 = vmatpush3.msra.mxu0 %v66_v3  ;;  %365 = vmatprep.subr.mxu1 %v167_v9  ;;  %v57_v22 = vld [vmem:[#allocation2 + $0x18] sm:$0xff]  ;;  %v56_v24 = vld [vmem:[#allocation2 + $0x10] sm:$0xff]  ;;  %v159_v25 = vld [vmem:[#allocation5 + $0x28] sm:$0xff] }
  0x25   :  { %334 = vmatprep.subr.mxu0 %v65_v5  ;;  %366 = vmatpush3.msra.mxu1 %v167_v9  ;;  %v55_v26 = vld [vmem:[#allocation2 + $0x8] sm:$0xff]  ;;  %v158_v27 = vld [vmem:[#allocation5 + $0x20] sm:$0xff]  ;;  %v157_v30 = vld [vmem:[#allocation5 + $0x18] sm:$0xff] }
  0x26   :  { %335 = vmatpush3.msra.mxu0 %v65_v5  ;;  %367 = vmatprep.subr.mxu1 %v166_v11  ;;  %v54_v28 = vld [vmem:[#allocation2] sm:$0xff]  ;;  %v53_v29 = vld [vmem:[%s551_s1 + $0x8] sm:$0xff]  ;;  %v156_v31 = vld [vmem:[#allocation5 + $0x10] sm:$0xff] }
  0x27   :  { %336 = vmatprep.subr.mxu0 %v64_v8  ;;  %368 = vmatpush3.msra.mxu1 %v166_v11  ;;  %v155_v32 = vld [vmem:[#allocation5 + $0x8] sm:$0xff]  ;;  %v154_v33 = vld [vmem:[#allocation5] sm:$0xff] }
  0x28   :  { %337 = vmatpush3.msra.mxu0 %v64_v8  ;;  %369 = vmatprep.subr.mxu1 %v165_v13  ;;  %v252_v34 = vld [vmem:[%s550_s0] sm:$0xff]  ;;  %v253_v35 = vld [vmem:[%s550_s0 + $0x8] sm:$0xff] }
  0x29   :  { %338 = vmatprep.subr.mxu0 %v63_v10  ;;  %370 = vmatpush3.msra.mxu1 %v165_v13  ;;  %vm254_vm0 = vcmp.eq.s32.totalorder %v252_v34, 0  ;;  %vm255_vm1 = vcmp.eq.s32.totalorder %v253_v35, 0  ;;  %v288_v39 = vld [vmem:[%s553_s3] ss:$0 sm:$0xff]  ;;  %s443_s3 = scalar_lea.vmem %s276_s18, 256 }
  0x2a   :  { %339 = vmatpush3.msra.mxu0 %v63_v10  ;;  %371 = vmatprep.subr.mxu1 %v164_v15  ;;  %v256_v37 = vsel %vm254_vm0, 1, %v473_v36  ;;  %v257_v38 = vsel %vm255_vm1, 1, %v473_v36  ;;  %v289_v47 = vld [vmem:[%s555_s5] ss:$0 sm:$0xff]  ;;  %p444_p10 = scmp.ne.s32.totalorder %s276_s18, %s443_s3  ;;  %p449_p12 = scmp.lt.s32.totalorder %s443_s3, %s443_s3 }
  0x2b   :  { %340 = vmatprep.subr.mxu0 %v62_v12  ;;  %372 = vmatpush3.msra.mxu1 %v164_v15 }
  0x2c   :  { %341 = vmatpush3.msra.mxu0 %v62_v12  ;;  %373 = vmatprep.subr.mxu1 %v163_v17  ;;  %p450_p13 = por %p449_p12, %p448_p11 }
  0x2d   :  { %342 = vmatprep.subr.mxu0 %v61_v14  ;;  %374 = vmatpush3.msra.mxu1 %v163_v17 }
  0x2e   :  { %343 = vmatpush3.msra.mxu0 %v61_v14  ;;  %375 = vmatprep.subr.mxu1 %v162_v19  ;;  %p451_p0 = pnand %p450_p13, %p444_p10 }
  0x2f   :  { %344 = vmatprep.subr.mxu0 %v60_v16  ;;  %376 = vmatpush3.msra.mxu1 %v162_v19 }
  0x30   :  { %345 = vmatpush3.msra.mxu0 %v60_v16  ;;  %377 = vmatprep.subr.mxu1 %v161_v21 }
  0x31   :  { %346 = vmatprep.subr.mxu0 %v59_v18  ;;  %378 = vmatpush3.msra.mxu1 %v161_v21 }
  0x32   :  { %347 = vmatpush3.msra.mxu0 %v59_v18  ;;  %379 = vmatprep.subr.mxu1 %v160_v23 }
  0x33   :  { %348 = vmatprep.subr.mxu0 %v58_v20  ;;  %380 = vmatpush3.msra.mxu1 %v160_v23 }
  0x34   :  { %349 = vmatpush3.msra.mxu0 %v58_v20  ;;  %381 = vmatprep.subr.mxu1 %v159_v25 }
  0x35   :  { %350 = vmatprep.subr.mxu0 %v57_v22  ;;  %382 = vmatpush3.msra.mxu1 %v159_v25 }
  0x36   :  { %351 = vmatpush3.msra.mxu0 %v57_v22  ;;  %383 = vmatprep.subr.mxu1 %v158_v27 }
  0x37   :  { %352 = vmatprep.subr.mxu0 %v56_v24  ;;  %384 = vmatpush3.msra.mxu1 %v158_v27 }
  0x38   :  { %353 = vmatpush3.msra.mxu0 %v56_v24  ;;  %385 = vmatprep.subr.mxu1 %v157_v30 }
  0x39   :  { %354 = vmatprep.subr.mxu0 %v55_v26  ;;  %386 = vmatpush3.msra.mxu1 %v157_v30 }
  0x3a   :  { %355 = vmatpush3.msra.mxu0 %v55_v26  ;;  %387 = vmatprep.subr.mxu1 %v156_v31 }
  0x3b   :  { %356 = vmatprep.subr.mxu0 %v54_v28  ;;  %388 = vmatpush3.msra.mxu1 %v156_v31 }
  0x3c   :  { %357 = vmatpush3.msra.mxu0 %v54_v28  ;;  %389 = vmatprep.subr.mxu1 %v155_v32 }
  0x3d   :  { %359 = vmatmul.mubr.f32.vlgmr.msra.gmra.mxu0 %v53_v29  ;;  %390 = vmatpush3.msra.mxu1 %v155_v32 }
  0x3e   :  { %391 = vmatprep.subr.mxu1 %v154_v33  ;;  %259 = vperm.xlu0 %402, %v256_v37  }
  0x3f   :  { %392 = vmatpush3.msra.mxu1 %v154_v33 }
  0x42   :  { %262 = vperm.xlu0 %402, %v257_v38  }
  0xb9   :  { %v260_v46 = vpop.permute.xlu0 %259 }
  0xba   :  { %vm264_vm3 = vcmp.eq.s32.totalorder %v260_v46, 1 }
  0xbd   :  { %v263_v48 = vpop.permute.xlu0 %262 }
  0xbe   :  { %vm265_vm2 = vcmp.eq.s32.totalorder %v263_v48, 1 }
  0xfd   :  { %v360_v40 = vpop.f32.mrf.mxu0 }
  0xfe   :  { %v149_v41 = vadd.f32 %v360_v40, %v288_v39 }
  0xff   :  { %v143_v42 = vpop.f32.mrf.mxu0 }
 0x100   :  { %v144_v43 = vadd.f32 %v288_v39, %v143_v42  ;;  %v153_v45 = vmax.f32 %v149_v41, 0.0 }
 0x102   :  { %v152_v44 = vmax.f32 %v144_v43, 0.0 }
 0x104   :  { %393 = vmatprep.mubr.f32.mxu1 %v152_v44 }
 0x105   :  { %394 = vmatmul.mubr.f32.vlgmr.msra.gmra.mxu1 %v153_v45 }
 0x1c5   :  { %v395_v49 = vpop.f32.mrf.mxu1 }
 0x1c6   :  { %v249_v50 = vadd.f32 %v395_v49, %v289_v47 }
 0x1c7   :  { %v243_v51 = vpop.f32.mrf.mxu1 }
 0x1c8   :  { %v244_v52 = vadd.f32 %v289_v47, %v243_v51  ;;  %v267_v53 = vsel %vm265_vm2, %v249_v50, %v53_v29 }
 0x1c9   :  { %269 = vst [vmem:[#allocation7 + $0x8] sm:$0xff] %v267_v53 }
 0x1ca   :  { %v266_v54 = vsel %vm264_vm3, %v244_v52, %v525_v4 }
 0x1cb   :  { %268 = vst [vmem:[#allocation7] sm:$0xff] %v266_v54 }
 0x1cc   :  { %454 = shalt.err (!%p451_p0)
}
 0x1cd   :  { %281 = dma.vmem_to_hbm [thread:$0]  %s276_s18, 256, %s556_s6, [#allocation4], %s470_s24, %s470_s24, %s471_s25  }
 0x1ce   :  { %467 = dma.done.wait [#allocation4], 256  }
 0x1cf   :  { %468 = vsyncadd [#allocation4], 4294967040 }
 0x1d0   :  { %285 = vsyncpa [#allocation3], 1 }
 0x1d1   :  { %286 = vsyncpa [#allocation6], 1 }
 0x1d2   :  { %287 = vsyncpa [#allocation4], 1 }

</bundles_post_ra>
